<compile_context>
chip_gen: v7x
topology: tpu7x:2x2x1
jax: 0.10.0
libtpu: 0.0.40
codegen_flags: <defaults>
</compile_context>

<pallas_src>
import jax
import jax.numpy as jnp
from jax.experimental import pallas as pl
from jax.experimental.pallas import tpu as pltpu

LANE = 128


def _round_up(n, m):
    return ((n + m - 1) // m) * m


def _pad2(a, rows, cols):
    r, c = a.shape
    return jnp.pad(a, ((0, rows - r), (0, cols - c)))


def vae_kernel(x_ref, w1_ref, b1_ref,
               w2m_ref, b2m_ref, w2l_ref, b2l_ref,
               w3_ref, b3_ref, w4_ref, b4_ref,
               recon_ref, mu_ref, logvar_ref):
    cdt = w1_ref.dtype  # matmul input dtype (f32 or bf16); accumulation is f32

    # ----- encoder -----
    x = x_ref[...]                                                    # (TB, Din_p)
    h1 = jnp.dot(x, w1_ref[...], preferred_element_type=jnp.float32) + b1_ref[...]
    h1 = jnp.maximum(h1, 0.0)                                         # ReLU (f32, VPU)
    h1c = h1.astype(cdt)

    # Separate lane-dense matmuls for mu and log_var (no in-kernel column split).
    mu = jnp.dot(h1c, w2m_ref[...], preferred_element_type=jnp.float32) + b2m_ref[...]
    log_var = jnp.dot(h1c, w2l_ref[...], preferred_element_type=jnp.float32) + b2l_ref[...]
    mu_ref[...] = mu
    logvar_ref[...] = log_var

    # ----- reparametrize (eval mode: z = mu; z is aliased to mu in the wrapper) -----
    z = mu.astype(cdt)

    # ----- decoder -----
    h2 = jnp.dot(z, w3_ref[...], preferred_element_type=jnp.float32) + b3_ref[...]
    h2 = jnp.maximum(h2, 0.0)                                         # ReLU (f32)
    rec = jnp.dot(h2.astype(cdt), w4_ref[...],
                  preferred_element_type=jnp.float32) + b4_ref[...]
    recon_ref[...] = jnp.tanh(rec)                                    # Tanh (EUP, f32)


def vae_forward(x, params, features, *, tb=128, compute_dtype=jnp.float32):
    """Fused VAE forward.

    x: (B, input_dim) f32.  params: (w1,b1,w2,b2,w3,b3,w4,b4) in (in,out) layout.
    Batch is tiled by `tb` (weight-stationary grid); feature dims are padded to
    the 128-lane width and the padding is sliced off before returning.
    compute_dtype=jnp.bfloat16 enables the bf16 MXU path (f32 accumulate).
    """
    w1, b1, w2, b2, w3, b3, w4, b4 = params
    B, input_dim = x.shape
    mid_dim = w1.shape[1]
    F = features

    Din = _round_up(input_dim, LANE)
    Dmid = _round_up(mid_dim, LANE)
    Fp = _round_up(F, LANE)
    TB = tb
    Bp = _round_up(B, TB)

    # Split encoder head: .view(-1, 2, F) => mu = first F cols, log_var = next F.
    w2m, w2l = w2[:, :F], w2[:, F:2 * F]
    b2m, b2l = b2[:, :F], b2[:, F:2 * F]

    cd = compute_dtype
    xp = _pad2(x, Bp, Din).astype(cd)
    w1p = _pad2(w1, Din, Dmid).astype(cd)
    b1p = _pad2(b1, 1, Dmid)                      # biases stay f32 (v5e-safe VPU math)
    w2mp = _pad2(w2m, Dmid, Fp).astype(cd)
    b2mp = _pad2(b2m, 1, Fp)
    w2lp = _pad2(w2l, Dmid, Fp).astype(cd)
    b2lp = _pad2(b2l, 1, Fp)
    w3p = _pad2(w3, Fp, Dmid).astype(cd)
    b3p = _pad2(b3, 1, Dmid)
    w4p = _pad2(w4, Dmid, Din).astype(cd)
    b4p = _pad2(b4, 1, Din)

    grid = (Bp // TB,)

    def row_spec(shape):                          # batch-tiled arrays
        return pl.BlockSpec(shape, lambda i: (i, 0))

    def fix_spec(shape):                          # weight-stationary (VMEM-resident)
        return pl.BlockSpec(shape, lambda i: (0, 0))

    out_shape = (
        jax.ShapeDtypeStruct((Bp, Din), jnp.float32),   # reconstruction (padded)
        jax.ShapeDtypeStruct((Bp, Fp), jnp.float32),    # mu (padded)
        jax.ShapeDtypeStruct((Bp, Fp), jnp.float32),    # log_var (padded)
    )

    recon_p, mu_p, logvar_p = pl.pallas_call(
        vae_kernel,
        out_shape=out_shape,
        grid=grid,
        in_specs=[
            row_spec((TB, Din)),
            fix_spec((Din, Dmid)), fix_spec((1, Dmid)),
            fix_spec((Dmid, Fp)), fix_spec((1, Fp)),
            fix_spec((Dmid, Fp)), fix_spec((1, Fp)),
            fix_spec((Fp, Dmid)), fix_spec((1, Dmid)),
            fix_spec((Dmid, Din)), fix_spec((1, Din)),
        ],
        out_specs=(row_spec((TB, Din)), row_spec((TB, Fp)), row_spec((TB, Fp))),
        compiler_params=pltpu.CompilerParams(
            # Batch rows are independent -> shard the grid across TensorCores (v7x).
            dimension_semantics=("parallel",),
            # Raise vmem_limit_bytes here if TB grows past ~512 padded rows.
        ),
    )(xp, w1p, b1p, w2mp, b2mp, w2lp, b2lp, w3p, b3p, w4p, b4p)

    recon = recon_p[:B, :input_dim]
    mu = mu_p[:B, :F]
    log_var = logvar_p[:B, :F]
    z = mu  # eval-mode reparametrization: z == mu (no separate writeback)
    return recon, mu, log_var, z


def init_params(key, input_dim, mid_dim, features):
    """Deterministic synthetic parameters. Weights stored as (in, out)."""
    ks = jax.random.split(key, 8)
    scale = 0.1
    w1 = scale * jax.random.normal(ks[0], (input_dim, mid_dim), jnp.float32)
    b1 = scale * jax.random.normal(ks[1], (1, mid_dim), jnp.float32)
    w2 = scale * jax.random.normal(ks[2], (mid_dim, 2 * features), jnp.float32)
    b2 = scale * jax.random.normal(ks[3], (1, 2 * features), jnp.float32)
    w3 = scale * jax.random.normal(ks[4], (features, mid_dim), jnp.float32)
    b3 = scale * jax.random.normal(ks[5], (1, mid_dim), jnp.float32)
    w4 = scale * jax.random.normal(ks[6], (mid_dim, input_dim), jnp.float32)
    b4 = scale * jax.random.normal(ks[7], (1, input_dim), jnp.float32)
    return (w1, b1, w2, b2, w3, b3, w4, b4)


def vae_forward_ref(x, params):
    """Pure-JAX reference for correctness checking (eval mode)."""
    w1, b1, w2, b2, w3, b3, w4, b4 = params
    h1 = jnp.maximum(x @ w1 + b1, 0.0)
    ml = h1 @ w2 + b2
    F = w3.shape[0]
    mu, log_var = ml[:, :F], ml[:, F:2 * F]
    z = mu
    h2 = jnp.maximum(z @ w3 + b3, 0.0)
    rec = jnp.tanh(h2 @ w4 + b4)
    return rec, mu, log_var, z


if __name__ == "__main__":
    B, input_dim, mid_dim, features = 8, 32, 64, 16

    key = jax.random.PRNGKey(0)
    k_x, k_p = jax.random.split(key)
    x = jax.random.normal(k_x, (B, input_dim), jnp.float32)
    params = init_params(k_p, input_dim, mid_dim, features)

    r_ref, mu_ref, lv_ref, z_ref = vae_forward_ref(x, params)

    # f32 path (exact parity with the reference)
    recon, mu, log_var, z = vae_forward(x, params, features,
                                        compute_dtype=jnp.float32)
    jax.block_until_ready((recon, mu, log_var, z))
    assert jnp.allclose(recon, r_ref, atol=1e-5)
    assert jnp.allclose(mu, mu_ref, atol=1e-5)
    assert jnp.allclose(log_var, lv_ref, atol=1e-5)
    assert jnp.allclose(z, z_ref, atol=1e-5)

    # bf16 matmul-input path (f32 accumulate) -- v6e/v7x MXU fast path
    recon_b, mu_b, lv_b, z_b = vae_forward(x, params, features,
                                           compute_dtype=jnp.bfloat16)
    jax.block_until_ready((recon_b, mu_b, lv_b, z_b))
    assert jnp.allclose(recon_b, r_ref, atol=5e-2, rtol=5e-2)
    assert jnp.allclose(mu_b, mu_ref, atol=5e-2, rtol=5e-2)
    assert jnp.allclose(lv_b, lv_ref, atol=5e-2, rtol=5e-2)

    print("KERNEL_OK")
</pallas_src>

<mosaic_0001>
module attributes {stable_mosaic.version = 11 : i64} {
  func.func @vae_kernel(%arg0: i32, %arg1: memref<128x128xf32, #tpu.memory_space<vmem>>, %arg2: memref<128x128xf32, #tpu.memory_space<vmem>>, %arg3: memref<1x128xf32, #tpu.memory_space<vmem>>, %arg4: memref<128x128xf32, #tpu.memory_space<vmem>>, %arg5: memref<1x128xf32, #tpu.memory_space<vmem>>, %arg6: memref<128x128xf32, #tpu.memory_space<vmem>>, %arg7: memref<1x128xf32, #tpu.memory_space<vmem>>, %arg8: memref<128x128xf32, #tpu.memory_space<vmem>>, %arg9: memref<1x128xf32, #tpu.memory_space<vmem>>, %arg10: memref<128x128xf32, #tpu.memory_space<vmem>>, %arg11: memref<1x128xf32, #tpu.memory_space<vmem>>, %arg12: memref<128x128xf32, #tpu.memory_space<vmem>>, %arg13: memref<128x128xf32, #tpu.memory_space<vmem>>, %arg14: memref<128x128xf32, #tpu.memory_space<vmem>>) attributes {dimension_semantics = [#tpu.dimension_semantics<parallel>], iteration_bounds = array<i64: 1>, scalar_prefetch = 0 : i64, scratch_operands = 0 : i64, tpu.core_type = #tpu.core_type<tc>, window_params = [{transform_indices = @transform_0, window_bounds = array<i64: 128, 128>}, {pipeline_mode = #tpu.pipeline_mode<synchronous>, transform_indices = @transform_1, window_bounds = array<i64: 128, 128>}, {pipeline_mode = #tpu.pipeline_mode<synchronous>, transform_indices = @transform_2, window_bounds = array<i64: 1, 128>}, {pipeline_mode = #tpu.pipeline_mode<synchronous>, transform_indices = @transform_3, window_bounds = array<i64: 128, 128>}, {pipeline_mode = #tpu.pipeline_mode<synchronous>, transform_indices = @transform_4, window_bounds = array<i64: 1, 128>}, {pipeline_mode = #tpu.pipeline_mode<synchronous>, transform_indices = @transform_5, window_bounds = array<i64: 128, 128>}, {pipeline_mode = #tpu.pipeline_mode<synchronous>, transform_indices = @transform_6, window_bounds = array<i64: 1, 128>}, {pipeline_mode = #tpu.pipeline_mode<synchronous>, transform_indices = @transform_7, window_bounds = array<i64: 128, 128>}, {pipeline_mode = #tpu.pipeline_mode<synchronous>, transform_indices = @transform_8, window_bounds = array<i64: 1, 128>}, {pipeline_mode = #tpu.pipeline_mode<synchronous>, transform_indices = @transform_9, window_bounds = array<i64: 128, 128>}, {pipeline_mode = #tpu.pipeline_mode<synchronous>, transform_indices = @transform_10, window_bounds = array<i64: 1, 128>}, {transform_indices = @transform_11, window_bounds = array<i64: 128, 128>}, {transform_indices = @transform_12, window_bounds = array<i64: 128, 128>}, {transform_indices = @transform_13, window_bounds = array<i64: 128, 128>}]} {
    %c0 = arith.constant 0 : index
    %c0_0 = arith.constant 0 : index
    %0 = vector.load %arg1[%c0, %c0_0] : memref<128x128xf32, #tpu.memory_space<vmem>>, vector<128x128xf32>
    %c0_1 = arith.constant 0 : index
    %c0_2 = arith.constant 0 : index
    %1 = vector.load %arg2[%c0_1, %c0_2] : memref<128x128xf32, #tpu.memory_space<vmem>>, vector<128x128xf32>
    %cst = arith.constant dense<0.000000e+00> : vector<128x128xf32>
    %2 = tpu.matmul %0, %1, %cst {dimension_numbers = #tpu.dot_dimension_numbers<[1], [0], [0], [1], [0, 0, 1, 1], [], []>} : vector<128x128xf32>, vector<128x128xf32>, vector<128x128xf32> -> vector<128x128xf32>
    %c0_3 = arith.constant 0 : index
    %c0_4 = arith.constant 0 : index
    %3 = vector.load %arg3[%c0_3, %c0_4] : memref<1x128xf32, #tpu.memory_space<vmem>>, vector<1x128xf32>
    %4 = vector.broadcast %3 : vector<1x128xf32> to vector<128x128xf32>
    %5 = arith.addf %2, %4 : vector<128x128xf32>
    %cst_5 = arith.constant 0.000000e+00 : f32
    %6 = vector.broadcast %cst_5 : f32 to vector<128x128xf32>
    %7 = arith.maximumf %5, %6 : vector<128x128xf32>
    %c0_6 = arith.constant 0 : index
    %c0_7 = arith.constant 0 : index
    %8 = vector.load %arg4[%c0_6, %c0_7] : memref<128x128xf32, #tpu.memory_space<vmem>>, vector<128x128xf32>
    %cst_8 = arith.constant dense<0.000000e+00> : vector<128x128xf32>
    %9 = tpu.matmul %7, %8, %cst_8 {dimension_numbers = #tpu.dot_dimension_numbers<[1], [0], [0], [1], [0, 0, 1, 1], [], []>} : vector<128x128xf32>, vector<128x128xf32>, vector<128x128xf32> -> vector<128x128xf32>
    %c0_9 = arith.constant 0 : index
    %c0_10 = arith.constant 0 : index
    %10 = vector.load %arg5[%c0_9, %c0_10] : memref<1x128xf32, #tpu.memory_space<vmem>>, vector<1x128xf32>
    %11 = vector.broadcast %10 : vector<1x128xf32> to vector<128x128xf32>
    %12 = arith.addf %9, %11 : vector<128x128xf32>
    %c0_11 = arith.constant 0 : index
    %c0_12 = arith.constant 0 : index
    %13 = vector.load %arg6[%c0_11, %c0_12] : memref<128x128xf32, #tpu.memory_space<vmem>>, vector<128x128xf32>
    %cst_13 = arith.constant dense<0.000000e+00> : vector<128x128xf32>
    %14 = tpu.matmul %7, %13, %cst_13 {dimension_numbers = #tpu.dot_dimension_numbers<[1], [0], [0], [1], [0, 0, 1, 1], [], []>} : vector<128x128xf32>, vector<128x128xf32>, vector<128x128xf32> -> vector<128x128xf32>
    %c0_14 = arith.constant 0 : index
    %c0_15 = arith.constant 0 : index
    %15 = vector.load %arg7[%c0_14, %c0_15] : memref<1x128xf32, #tpu.memory_space<vmem>>, vector<1x128xf32>
    %16 = vector.broadcast %15 : vector<1x128xf32> to vector<128x128xf32>
    %17 = arith.addf %14, %16 : vector<128x128xf32>
    %c0_16 = arith.constant 0 : index
    %c0_17 = arith.constant 0 : index
    %18 = vector.load %arg13[%c0_16, %c0_17] : memref<128x128xf32, #tpu.memory_space<vmem>>, vector<128x128xf32>
    tpu.vector_store %arg13[%c0_16, %c0_17], %12 {strides = array<i32>} : memref<128x128xf32, #tpu.memory_space<vmem>>, vector<128x128xf32>,
    %c0_18 = arith.constant 0 : index
    %c0_19 = arith.constant 0 : index
    %19 = vector.load %arg14[%c0_18, %c0_19] : memref<128x128xf32, #tpu.memory_space<vmem>>, vector<128x128xf32>
    tpu.vector_store %arg14[%c0_18, %c0_19], %17 {strides = array<i32>} : memref<128x128xf32, #tpu.memory_space<vmem>>, vector<128x128xf32>,
    %c0_20 = arith.constant 0 : index
    %c0_21 = arith.constant 0 : index
    %20 = vector.load %arg8[%c0_20, %c0_21] : memref<128x128xf32, #tpu.memory_space<vmem>>, vector<128x128xf32>
    %cst_22 = arith.constant dense<0.000000e+00> : vector<128x128xf32>
    %21 = tpu.matmul %12, %20, %cst_22 {dimension_numbers = #tpu.dot_dimension_numbers<[1], [0], [0], [1], [0, 0, 1, 1], [], []>} : vector<128x128xf32>, vector<128x128xf32>, vector<128x128xf32> -> vector<128x128xf32>
    %c0_23 = arith.constant 0 : index
    %c0_24 = arith.constant 0 : index
    %22 = vector.load %arg9[%c0_23, %c0_24] : memref<1x128xf32, #tpu.memory_space<vmem>>, vector<1x128xf32>
    %23 = vector.broadcast %22 : vector<1x128xf32> to vector<128x128xf32>
    %24 = arith.addf %21, %23 : vector<128x128xf32>
    %cst_25 = arith.constant 0.000000e+00 : f32
    %25 = vector.broadcast %cst_25 : f32 to vector<128x128xf32>
    %26 = arith.maximumf %24, %25 : vector<128x128xf32>
    %c0_26 = arith.constant 0 : index
    %c0_27 = arith.constant 0 : index
    %27 = vector.load %arg10[%c0_26, %c0_27] : memref<128x128xf32, #tpu.memory_space<vmem>>, vector<128x128xf32>
    %cst_28 = arith.constant dense<0.000000e+00> : vector<128x128xf32>
    %28 = tpu.matmul %26, %27, %cst_28 {dimension_numbers = #tpu.dot_dimension_numbers<[1], [0], [0], [1], [0, 0, 1, 1], [], []>} : vector<128x128xf32>, vector<128x128xf32>, vector<128x128xf32> -> vector<128x128xf32>
    %c0_29 = arith.constant 0 : index
    %c0_30 = arith.constant 0 : index
    %29 = vector.load %arg11[%c0_29, %c0_30] : memref<1x128xf32, #tpu.memory_space<vmem>>, vector<1x128xf32>
    %30 = vector.broadcast %29 : vector<1x128xf32> to vector<128x128xf32>
    %31 = arith.addf %28, %30 : vector<128x128xf32>
    %32 = math.tanh %31 : vector<128x128xf32>
    %c0_31 = arith.constant 0 : index
    %c0_32 = arith.constant 0 : index
    %33 = vector.load %arg12[%c0_31, %c0_32] : memref<128x128xf32, #tpu.memory_space<vmem>>, vector<128x128xf32>
    tpu.vector_store %arg12[%c0_31, %c0_32], %32 {strides = array<i32>} : memref<128x128xf32, #tpu.memory_space<vmem>>, vector<128x128xf32>,
    return
  }
  func.func @transform_0(%arg0: i32) -> (i32, i32) {
    %c0_i32 = arith.constant 0 : i32
    %c0_i32_0 = arith.constant 0 : i32
    return %arg0, %c0_i32 : i32, i32
  }
  func.func @transform_1(%arg0: i32) -> (i32, i32) {
    %c0_i32 = arith.constant 0 : i32
    %c0_i32_0 = arith.constant 0 : i32
    %c0_i32_1 = arith.constant 0 : i32
    return %c0_i32, %c0_i32_0 : i32, i32
  }
  func.func @transform_2(%arg0: i32) -> (i32, i32) {
    %c0_i32 = arith.constant 0 : i32
    %c0_i32_0 = arith.constant 0 : i32
    %c0_i32_1 = arith.constant 0 : i32
    return %c0_i32, %c0_i32_0 : i32, i32
  }
  func.func @transform_3(%arg0: i32) -> (i32, i32) {
    %c0_i32 = arith.constant 0 : i32
    %c0_i32_0 = arith.constant 0 : i32
    %c0_i32_1 = arith.constant 0 : i32
    return %c0_i32, %c0_i32_0 : i32, i32
  }
  func.func @transform_4(%arg0: i32) -> (i32, i32) {
    %c0_i32 = arith.constant 0 : i32
    %c0_i32_0 = arith.constant 0 : i32
    %c0_i32_1 = arith.constant 0 : i32
    return %c0_i32, %c0_i32_0 : i32, i32
  }
  func.func @transform_5(%arg0: i32) -> (i32, i32) {
    %c0_i32 = arith.constant 0 : i32
    %c0_i32_0 = arith.constant 0 : i32
    %c0_i32_1 = arith.constant 0 : i32
    return %c0_i32, %c0_i32_0 : i32, i32
  }
  func.func @transform_6(%arg0: i32) -> (i32, i32) {
    %c0_i32 = arith.constant 0 : i32
    %c0_i32_0 = arith.constant 0 : i32
    %c0_i32_1 = arith.constant 0 : i32
    return %c0_i32, %c0_i32_0 : i32, i32
  }
  func.func @transform_7(%arg0: i32) -> (i32, i32) {
    %c0_i32 = arith.constant 0 : i32
    %c0_i32_0 = arith.constant 0 : i32
    %c0_i32_1 = arith.constant 0 : i32
    return %c0_i32, %c0_i32_0 : i32, i32
  }
  func.func @transform_8(%arg0: i32) -> (i32, i32) {
    %c0_i32 = arith.constant 0 : i32
    %c0_i32_0 = arith.constant 0 : i32
    %c0_i32_1 = arith.constant 0 : i32
    return %c0_i32, %c0_i32_0 : i32, i32
  }
  func.func @transform_9(%arg0: i32) -> (i32, i32) {
    %c0_i32 = arith.constant 0 : i32
    %c0_i32_0 = arith.constant 0 : i32
    %c0_i32_1 = arith.constant 0 : i32
    return %c0_i32, %c0_i32_0 : i32, i32
  }
  func.func @transform_10(%arg0: i32) -> (i32, i32) {
    %c0_i32 = arith.constant 0 : i32
    %c0_i32_0 = arith.constant 0 : i32
    %c0_i32_1 = arith.constant 0 : i32
    return %c0_i32, %c0_i32_0 : i32, i32
  }
  func.func @transform_11(%arg0: i32) -> (i32, i32) {
    %c0_i32 = arith.constant 0 : i32
    %c0_i32_0 = arith.constant 0 : i32
    return %arg0, %c0_i32 : i32, i32
  }
  func.func @transform_12(%arg0: i32) -> (i32, i32) {
    %c0_i32 = arith.constant 0 : i32
    %c0_i32_0 = arith.constant 0 : i32
    return %arg0, %c0_i32 : i32, i32
  }
  func.func @transform_13(%arg0: i32) -> (i32, i32) {
    %c0_i32 = arith.constant 0 : i32
    %c0_i32_0 = arith.constant 0 : i32
    return %arg0, %c0_i32 : i32, i32
  }
}

</mosaic_0001>

<bundles_post_ra>
// kernel: tpu_custom_call.1
= control target key start
LH: loop header
LB: loop body
LE: loop exit
PB: predicated region body
PF: predicated region fallthrough
CT: control target
= control target key end

     0   :  { %19 = vsyncpa [#allocation3], 0  ;;  %s2362_s0 = inlined_call_operand.hbm [shape: f32[128,128], index: 0, kind: input, shape index: {}]   ;;  %s2363_s1 = inlined_call_operand.hbm [shape: f32[128,128], index: 1, kind: input, shape index: {}]   ;;  %s2364_s2 = inlined_call_operand.vmem [shape: f32[1,128], index: 2, kind: input, shape index: {}]   ;;  %s2365_s3 = inlined_call_operand.hbm [shape: f32[128,128], index: 3, kind: input, shape index: {}]   ;;  %s2366_s4 = inlined_call_operand.vmem [shape: f32[1,128], index: 4, kind: input, shape index: {}]   ;;  %s2367_s5 = inlined_call_operand.hbm [shape: f32[128,128], index: 5, kind: input, shape index: {}]   ;;  %s2368_s6 = inlined_call_operand.vmem [shape: f32[1,128], index: 6, kind: input, shape index: {}]   ;;  %s2369_s7 = inlined_call_operand.hbm [shape: f32[128,128], index: 7, kind: input, shape index: {}]   ;;  %s2370_s8 = inlined_call_operand.vmem [shape: f32[1,128], index: 8, kind: input, shape index: {}]   ;;  %s2371_s9 = inlined_call_operand.hbm [shape: f32[128,128], index: 9, kind: input, shape index: {}]   ;;  %s2372_s10 = inlined_call_operand.vmem [shape: f32[1,128], index: 10, kind: input, shape index: {}]   ;;  %s2373_s11 = inlined_call_operand.hbm [shape: f32[128,128], index: 11, kind: output, shape index: {0}]   ;;  %s2374_s12 = inlined_call_operand.hbm [shape: f32[128,128], index: 12, kind: output, shape index: {1}]   ;;  %s2375_s13 = inlined_call_operand.hbm [shape: f32[128,128], index: 13, kind: output, shape index: {2}]  }
   0x1   :  { %20 = vsyncpa [#allocation6], 0 }
   0x2   :  { %21 = vsyncpa [#allocation9], 0 }
   0x3   :  { %22 = vsyncpa [#allocation12], 0 }
   0x4   :  { %23 = vsyncpa [#allocation4], 0 }
   0x5   :  { %24 = vsyncpa [#allocation15], 0  ;;  %s2002_s25 = smov [#allocation5]   ;;  %s2003_s27 = smov [#allocation8]  }
   0x6   :  { %s42_s26 = sshll.u32 %s2002_s25, 4  ;;  %s70_s28 = sshll.u32 %s2003_s27, 4  ;;  %s43_s26 = int_to_ptr.vmem [resolvable:$true] %s42_s26  ;;  %s2083_s28 = int_to_ptr.vmem [resolvable:$true] %s70_s28 }
   0x7   :  { %s1792_s14 = scalar_lea.hbm %s2363_s1, 2048 }
   0x8   :  { %p1793_p0 = scmp.ne.s32.totalorder %s2363_s1, %s1792_s14  ;;  %p1796_p1 = scmp.lt.u32.totalorder %s1792_s14, %s2363_s1 }
   0xa   :  { %p1798_p2 = pnand %p1796_p1, %p1793_p0 }
   0xc   :  { %1801 = shalt.err (!%p1798_p2)
}
   0xd   :  { %s1802_s19 = scalar_lea.vmem %s43_s26, 2048  ;;  %p1807_p4 = scmp.lt.s32.totalorder %s43_s26, %s43_s26 }
   0xe   :  { %p1803_p3 = scmp.ne.s32.totalorder %s43_s26, %s1802_s19  ;;  %p1808_p5 = scmp.lt.s32.totalorder %s1802_s19, %s1802_s19 }
  0x10   :  { %p1809_p6 = por %p1808_p5, %p1807_p4 }
  0x12   :  { %p1810_p7 = pnand %p1809_p6, %p1803_p3 }
  0x14   :  { %1813 = shalt.err (!%p1810_p7)
}
  0x15   :  { %s2004_s20 = smov 128   ;;  %s2005_s21 = smov 8  }
  0x16   :  { %48 = dma.hbm_to_vmem [thread:$0]  %s2363_s1, 2048, %s43_s26, [#allocation6], %s2004_s20, %s2004_s20, %s2005_s21  }
  0x17   :  { %s1814_s27 = scalar_lea.hbm %s2367_s5, 2048 }
  0x18   :  { %p1815_p8 = scmp.ne.s32.totalorder %s2367_s5, %s1814_s27  ;;  %p1818_p9 = scmp.lt.u32.totalorder %s1814_s27, %s2367_s5 }
  0x1a   :  { %p1820_p10 = pnand %p1818_p9, %p1815_p8 }
  0x1c   :  { %1823 = shalt.err (!%p1820_p10)
}
  0x1d   :  { %s1824_s16 = scalar_lea.vmem %s2083_s28, 2048  ;;  %p1829_p12 = scmp.lt.s32.totalorder %s2083_s28, %s2083_s28 }
  0x1e   :  { %p1825_p11 = scmp.ne.s32.totalorder %s2083_s28, %s1824_s16  ;;  %p1830_p13 = scmp.lt.s32.totalorder %s1824_s16, %s1824_s16 }
  0x20   :  { %p1831_p0 = por %p1830_p13, %p1829_p12 }
  0x22   :  { %p1832_p1 = pnand %p1831_p0, %p1825_p11 }
  0x24   :  { %1835 = shalt.err (!%p1832_p1)
}
  0x25   :  { %76 = dma.hbm_to_vmem [thread:$0]  %s2367_s5, 2048, %s2083_s28, [#allocation9], %s2004_s20, %s2004_s20, %s2005_s21  }
  0x26   :  { %s2006_s17 = smov [#allocation2]   ;;  %s2007_s19 = smov [#allocation7]  }
  0x27   :  { %s30_s18 = sshll.u32 %s2006_s17, 4  ;;  %s56_s22 = sshll.u32 %s2007_s19, 4  ;;  %s31_s18 = int_to_ptr.vmem [resolvable:$true] %s30_s18  ;;  %s2120_s22 = int_to_ptr.vmem [resolvable:$true] %s56_s22 }
  0x28   :  { %s1836_s25 = scalar_lea.hbm %s2362_s0, 2048 }
  0x29   :  { %p1837_p2 = scmp.ne.s32.totalorder %s2362_s0, %s1836_s25  ;;  %p1840_p3 = scmp.lt.u32.totalorder %s1836_s25, %s2362_s0 }
  0x2b   :  { %p1842_p4 = pnand %p1840_p3, %p1837_p2 }
  0x2d   :  { %1845 = shalt.err (!%p1842_p4)
}
  0x2e   :  { %s1846_s5 = scalar_lea.vmem %s31_s18, 2048  ;;  %p1851_p6 = scmp.lt.s32.totalorder %s31_s18, %s31_s18 }
  0x2f   :  { %p1847_p5 = scmp.ne.s32.totalorder %s31_s18, %s1846_s5  ;;  %p1852_p7 = scmp.lt.s32.totalorder %s1846_s5, %s1846_s5 }
  0x31   :  { %p1853_p8 = por %p1852_p7, %p1851_p6 }
  0x33   :  { %p1854_p9 = pnand %p1853_p8, %p1847_p5 }
  0x35   :  { %1857 = shalt.err (!%p1854_p9)
}
  0x36   :  { %36 = dma.hbm_to_vmem [thread:$0]  %s2362_s0, 2048, %s31_s18, [#allocation3], %s2004_s20, %s2004_s20, %s2005_s21  }
  0x37   :  { %s1858_s26 = scalar_lea.hbm %s2365_s3, 2048 }
  0x38   :  { %p1859_p10 = scmp.ne.s32.totalorder %s2365_s3, %s1858_s26  ;;  %p1862_p11 = scmp.lt.u32.totalorder %s1858_s26, %s2365_s3 }
  0x3a   :  { %p1864_p12 = pnand %p1862_p11, %p1859_p10 }
  0x3c   :  { %1867 = shalt.err (!%p1864_p12)
}
  0x3d   :  { %s1868_s25 = scalar_lea.vmem %s2120_s22, 2048  ;;  %p1873_p0 = scmp.lt.s32.totalorder %s2120_s22, %s2120_s22 }
  0x3e   :  { %p1869_p13 = scmp.ne.s32.totalorder %s2120_s22, %s1868_s25  ;;  %p1874_p1 = scmp.lt.s32.totalorder %s1868_s25, %s1868_s25 }
  0x40   :  { %p1875_p2 = por %p1874_p1, %p1873_p0 }
  0x42   :  { %p1876_p3 = pnand %p1875_p2, %p1869_p13 }
  0x44   :  { %1879 = shalt.err (!%p1876_p3)
}
  0x45   :  { %62 = dma.hbm_to_vmem [thread:$0]  %s2365_s3, 2048, %s2120_s22, [#allocation6], %s2004_s20, %s2004_s20, %s2005_s21  }
  0x46   :  { %s2008_s27 = smov [#allocation10]   ;;  %s2009_s30 = smov [#allocation11]  }
  0x47   :  { %s84_s29 = sshll.u32 %s2008_s27, 4  ;;  %s98_s14 = sshll.u32 %s2009_s30, 4  ;;  %s85_s29 = int_to_ptr.vmem [resolvable:$true] %s84_s29  ;;  %s2157_s14 = int_to_ptr.vmem [resolvable:$true] %s98_s14 }
  0x48   :  { %s1880_s15 = scalar_lea.hbm %s2369_s7, 2048 }
  0x49   :  { %p1881_p4 = scmp.ne.s32.totalorder %s2369_s7, %s1880_s15  ;;  %p1884_p5 = scmp.lt.u32.totalorder %s1880_s15, %s2369_s7 }
  0x4b   :  { %p1886_p6 = pnand %p1884_p5, %p1881_p4 }
  0x4d   :  { %1889 = shalt.err (!%p1886_p6)
}
  0x4e   :  { %s1890_s3 = scalar_lea.vmem %s85_s29, 2048  ;;  %p1895_p8 = scmp.lt.s32.totalorder %s85_s29, %s85_s29 }
  0x4f   :  { %p1891_p7 = scmp.ne.s32.totalorder %s85_s29, %s1890_s3  ;;  %p1896_p9 = scmp.lt.s32.totalorder %s1890_s3, %s1890_s3 }
  0x51   :  { %p1897_p10 = por %p1896_p9, %p1895_p8 }
  0x53   :  { %p1898_p11 = pnand %p1897_p10, %p1891_p7 }
  0x55   :  { %1901 = shalt.err (!%p1898_p11)
}
  0x56   :  { %90 = dma.hbm_to_vmem [thread:$0]  %s2369_s7, 2048, %s85_s29, [#allocation9], %s2004_s20, %s2004_s20, %s2005_s21  }
  0x57   :  { %s1902_s25 = scalar_lea.hbm %s2371_s9, 2048 }
  0x58   :  { %p1903_p12 = scmp.ne.s32.totalorder %s2371_s9, %s1902_s25  ;;  %p1906_p13 = scmp.lt.u32.totalorder %s1902_s25, %s2371_s9 }
  0x5a   :  { %p1908_p0 = pnand %p1906_p13, %p1903_p12 }
  0x5c   :  { %1911 = shalt.err (!%p1908_p0)
}
  0x5d   :  { %s1912_s5 = scalar_lea.vmem %s2157_s14, 2048  ;;  %p1917_p2 = scmp.lt.s32.totalorder %s2157_s14, %s2157_s14 }
  0x5e   :  { %p1913_p1 = scmp.ne.s32.totalorder %s2157_s14, %s1912_s5  ;;  %p1918_p3 = scmp.lt.s32.totalorder %s1912_s5, %s1912_s5 }
  0x60   :  { %p1919_p4 = por %p1918_p3, %p1917_p2 }
  0x62   :  { %p1920_p5 = pnand %p1919_p4, %p1913_p1 }
  0x64   :  { %1923 = shalt.err (!%p1920_p5)
}
  0x65   :  { %104 = dma.hbm_to_vmem [thread:$0]  %s2371_s9, 2048, %s2157_s14, [#allocation12], %s2004_s20, %s2004_s20, %s2005_s21  }
  0x66   :  { %1990 = dma.done.wait [#allocation3], 2048  }
  0x67   :  { %1991 = vsyncadd [#allocation3], 4294965248 }
  0x68   :  { %1992 = dma.done.wait [#allocation6], 4096  }
  0x69   :  { %1993 = vsyncadd [#allocation6], 4294963200 }
  0x6a   :  { %1994 = dma.done.wait [#allocation9], 4096  }
  0x6b   :  { %1995 = vsyncadd [#allocation9], 4294963200 }
  0x6c   :  { %1996 = dma.done.wait [#allocation12], 2048  }
  0x6d   :  { %1997 = vsyncadd [#allocation12], 4294965248  ;;  %v141_v0 = vld [vmem:[#allocation5] sm:$0xff]  ;;  %v142_v1 = vld [vmem:[#allocation5 + $0x8] sm:$0xff] }
  0x6e   :  { %v143_v2 = vld [vmem:[#allocation5 + $0x10] sm:$0xff]  ;;  %v1573_v3 = vpack.c.bf16 %v142_v1, %v141_v0  ;;  %v144_v4 = vld [vmem:[#allocation5 + $0x18] sm:$0xff]  ;;  %v145_v6 = vld [vmem:[#allocation5 + $0x20] sm:$0xff] }
  0x6f   :  { %v1577_v5 = vpack.c.bf16 %v144_v4, %v143_v2  ;;  %v146_v7 = vld [vmem:[#allocation5 + $0x28] sm:$0xff]  ;;  %v125_v9 = vld [vmem:[#allocation2] sm:$0xff]  ;;  %v147_v10 = vld [vmem:[#allocation5 + $0x30] sm:$0xff] }
  0x70   :  { %1574 = vmatprep.subr.bf16.mxu0 %v1573_v3  ;;  %v1581_v8 = vpack.c.bf16 %v146_v7, %v145_v6  ;;  %v148_v11 = vld [vmem:[#allocation5 + $0x38] sm:$0xff]  ;;  %1325 = vmatprep.mubr.f32.mxu0 %v125_v9  ;;  %v149_v13 = vld [vmem:[#allocation5 + $0x40] sm:$0xff]  ;;  %v150_v14 = vld [vmem:[#allocation5 + $0x48] sm:$0xff] }
  0x71   :  { %1576 = vmatpush3.bf16.msra.mxu0 %v1573_v3  ;;  %v1585_v12 = vpack.c.bf16 %v148_v11, %v147_v10  ;;  %v325_v15 = vld [vmem:[#allocation7] sm:$0xff]  ;;  %v326_v16 = vld [vmem:[#allocation7 + $0x8] sm:$0xff]  ;;  %v327_v18 = vld [vmem:[#allocation7 + $0x10] sm:$0xff]  ;;  %v1589_v20 = vpack.c.bf16 %v150_v14, %v149_v13 }
  0x72   :  { %1578 = vmatprep.subr.bf16.mxu0 %v1577_v5  ;;  %v1605_v17 = vpack.c.bf16 %v326_v16, %v325_v15  ;;  %v328_v19 = vld [vmem:[#allocation7 + $0x18] sm:$0xff]  ;;  %v329_v22 = vld [vmem:[#allocation7 + $0x20] sm:$0xff]  ;;  %v330_v23 = vld [vmem:[#allocation7 + $0x28] sm:$0xff] }
  0x73   :  { %v1609_v21 = vpack.c.bf16 %v328_v19, %v327_v18  ;;  %v151_v24 = vld [vmem:[#allocation5 + $0x50] sm:$0xff]  ;;  %v152_v25 = vld [vmem:[#allocation5 + $0x58] sm:$0xff]  ;;  %v1613_v26 = vpack.c.bf16 %v330_v23, %v329_v22  ;;  %v153_v30 = vld [vmem:[#allocation5 + $0x60] sm:$0xff] }
  0x74   :  { %1606 = vmatprep.subr.bf16.mxu1 %v1605_v17  ;;  %v1593_v27 = vpack.c.bf16 %v152_v25, %v151_v24  ;;  %v331_v28 = vld [vmem:[#allocation7 + $0x30] sm:$0xff]  ;;  %v332_v29 = vld [vmem:[#allocation7 + $0x38] sm:$0xff]  ;;  %v154_v31 = vld [vmem:[#allocation5 + $0x68] sm:$0xff] }
  0x75   :  { %1580 = vmatpush3.bf16.msra.mxu0 %v1577_v5  ;;  %1608 = vmatpush3.bf16.msra.mxu1 %v1605_v17  ;;  %v1617_v32 = vpack.c.bf16 %v332_v29, %v331_v28  ;;  %v1597_v33 = vpack.c.bf16 %v154_v31, %v153_v30  ;;  %v333_v34 = vld [vmem:[#allocation7 + $0x40] sm:$0xff]  ;;  %v334_v35 = vld [vmem:[#allocation7 + $0x48] sm:$0xff]  ;;  %v155_v36 = vld [vmem:[#allocation5 + $0x70] sm:$0xff] }
  0x76   :  { %1582 = vmatprep.subr.bf16.mxu0 %v1581_v8  ;;  %1610 = vmatprep.subr.bf16.mxu1 %v1609_v21  ;;  %v156_v37 = vld [vmem:[#allocation5 + $0x78] sm:$0xff]  ;;  %v1621_v38 = vpack.c.bf16 %v334_v35, %v333_v34  ;;  %v335_v40 = vld [vmem:[#allocation7 + $0x50] sm:$0xff]  ;;  %v493_v42 = vld [vmem:[#allocation8] sm:$0xff] }
  0x77   :  { %v1601_v39 = vpack.c.bf16 %v156_v37, %v155_v36  ;;  %v336_v41 = vld [vmem:[#allocation7 + $0x58] sm:$0xff]  ;;  %v494_v43 = vld [vmem:[#allocation8 + $0x8] sm:$0xff]  ;;  %v495_v46 = vld [vmem:[#allocation8 + $0x10] sm:$0xff] }
  0x78   :  { %v1625_v44 = vpack.c.bf16 %v336_v41, %v335_v40  ;;  %v1637_v45 = vpack.c.bf16 %v494_v43, %v493_v42  ;;  %v496_v47 = vld [vmem:[#allocation8 + $0x18] sm:$0xff]  ;;  %v337_v48 = vld [vmem:[#allocation7 + $0x60] sm:$0xff]  ;;  %v338_v49 = vld [vmem:[#allocation7 + $0x68] sm:$0xff] }
  0x79   :  { %1584 = vmatpush3.bf16.msra.mxu0 %v1581_v8  ;;  %1612 = vmatpush3.bf16.msra.mxu1 %v1609_v21  ;;  %v126_v50 = vld [vmem:[#allocation2 + $0x8] sm:$0xff]  ;;  %v127_v51 = vld [vmem:[#allocation2 + $0x10] sm:$0xff]  ;;  %v1641_v52 = vpack.c.bf16 %v496_v47, %v495_v46  ;;  %v1629_v53 = vpack.c.bf16 %v338_v49, %v337_v48  ;;  %v497_v54 = vld [vmem:[#allocation8 + $0x20] sm:$0xff] }
  0x7a   :  { %1586 = vmatprep.subr.bf16.mxu0 %v1585_v12  ;;  %1614 = vmatprep.subr.bf16.mxu1 %v1613_v26  ;;  %v498_v55 = vld [vmem:[#allocation8 + $0x28] sm:$0xff]  ;;  %v128_v56 = vld [vmem:[#allocation2 + $0x18] sm:$0xff]  ;;  %v129_v57 = vld [vmem:[#allocation2 + $0x20] sm:$0xff] }
  0x7b   :  { %v1645_v58 = vpack.c.bf16 %v498_v55, %v497_v54  ;;  %v499_v59 = vld [vmem:[#allocation8 + $0x30] sm:$0xff]  ;;  %v500_v60 = vld [vmem:[#allocation8 + $0x38] sm:$0xff]  ;;  %v130_v61 = vld [vmem:[#allocation2 + $0x28] sm:$0xff] }
  0x7c   :  { %v131_v62 = vld [vmem:[#allocation2 + $0x30] sm:$0xff]  ;;  %v1649_v63 = vpack.c.bf16 %v500_v60, %v499_v59  ;;  %v501_v0 = vld [vmem:[#allocation8 + $0x40] sm:$0xff]  ;;  %v502_v1 = vld [vmem:[#allocation8 + $0x48] sm:$0xff] }
  0x7d   :  { %1588 = vmatpush3.bf16.msra.mxu0 %v1585_v12  ;;  %1616 = vmatpush3.bf16.msra.mxu1 %v1613_v26  ;;  %v132_v2 = vld [vmem:[#allocation2 + $0x38] sm:$0xff]  ;;  %v133_v3 = vld [vmem:[#allocation2 + $0x40] sm:$0xff]  ;;  %v1653_v4 = vpack.c.bf16 %v502_v1, %v501_v0  ;;  %v503_v5 = vld [vmem:[#allocation8 + $0x50] sm:$0xff] }
  0x7e   :  { %1590 = vmatprep.subr.bf16.mxu0 %v1589_v20  ;;  %1618 = vmatprep.subr.bf16.mxu1 %v1617_v32  ;;  %v504_v6 = vld [vmem:[#allocation8 + $0x58] sm:$0xff]  ;;  %v134_v7 = vld [vmem:[#allocation2 + $0x48] sm:$0xff]  ;;  %v135_v8 = vld [vmem:[#allocation2 + $0x50] sm:$0xff] }
  0x7f   :  { %v1657_v9 = vpack.c.bf16 %v504_v6, %v503_v5  ;;  %v505_v10 = vld [vmem:[#allocation8 + $0x60] sm:$0xff]  ;;  %v506_v11 = vld [vmem:[#allocation8 + $0x68] sm:$0xff]  ;;  %v136_v12 = vld [vmem:[#allocation2 + $0x58] sm:$0xff] }
  0x80   :  { %v137_v13 = vld [vmem:[#allocation2 + $0x60] sm:$0xff]  ;;  %v1661_v14 = vpack.c.bf16 %v506_v11, %v505_v10  ;;  %v138_v15 = vld [vmem:[#allocation2 + $0x68] sm:$0xff]  ;;  %v139_v16 = vld [vmem:[#allocation2 + $0x70] sm:$0xff] }
  0x81   :  { %1592 = vmatpush3.bf16.msra.mxu0 %v1589_v20  ;;  %1620 = vmatpush3.bf16.msra.mxu1 %v1617_v32  ;;  %v140_v17 = vld [vmem:[#allocation2 + $0x78] sm:$0xff]  ;;  %v339_v18 = vld [vmem:[#allocation7 + $0x70] sm:$0xff]  ;;  %v693_v24 = vld [vmem:[#allocation10] sm:$0xff] }
  0x82   :  { %1594 = vmatprep.subr.bf16.mxu0 %v1593_v27  ;;  %1622 = vmatprep.subr.bf16.mxu1 %v1621_v38  ;;  %v340_v19 = vld [vmem:[#allocation7 + $0x78] sm:$0xff]  ;;  %v507_v21 = vld [vmem:[#allocation8 + $0x70] sm:$0xff]  ;;  %v694_v25 = vld [vmem:[#allocation10 + $0x8] sm:$0xff] }
  0x83   :  { %v1633_v20 = vpack.c.bf16 %v340_v19, %v339_v18  ;;  %v508_v22 = vld [vmem:[#allocation8 + $0x78] sm:$0xff]  ;;  %v1669_v26 = vpack.c.bf16 %v694_v25, %v693_v24  ;;  %v695_v32 = vld [vmem:[#allocation10 + $0x10] sm:$0xff]  ;;  %v697_v41 = vld [vmem:[#allocation10 + $0x20] sm:$0xff] }
  0x84   :  { %v1665_v23 = vpack.c.bf16 %v508_v22, %v507_v21  ;;  %v698_v42 = vld [vmem:[#allocation10 + $0x28] sm:$0xff]  ;;  %v701_v59 = vld [vmem:[#allocation10 + $0x40] sm:$0xff]  ;;  %v704_v5 = vld [vmem:[#allocation10 + $0x58] sm:$0xff] }
  0x85   :  { %1596 = vmatpush3.bf16.msra.mxu0 %v1593_v27  ;;  %1624 = vmatpush3.bf16.msra.mxu1 %v1621_v38  ;;  %v2197_v27 = vld [vmem:[%s2364_s2] ss:$0 sm:$0xff]  ;;  %v1677_v48 = vpack.c.bf16 %v698_v42, %v697_v41  ;;  %v702_v60 = vld [vmem:[#allocation10 + $0x48] sm:$0xff]  ;;  %v883_v42 = vld [vmem:[#allocation11 + $0x30] sm:$0xff] }
  0x86   :  { %1598 = vmatprep.subr.bf16.mxu0 %v1597_v33  ;;  %1626 = vmatprep.subr.bf16.mxu1 %v1625_v44 }
  0x89   :  { %1600 = vmatpush3.bf16.msra.mxu0 %v1597_v33  ;;  %1628 = vmatpush3.bf16.msra.mxu1 %v1625_v44  ;;  %v696_v33 = vld [vmem:[#allocation10 + $0x18] sm:$0xff] }
  0x8a   :  { %1602 = vmatprep.subr.bf16.mxu0 %v1601_v39  ;;  %1630 = vmatprep.subr.bf16.mxu1 %v1629_v53 }
  0x8d   :  { %1604 = vmatpush3.bf16.msra.mxu0 %v1601_v39  ;;  %1632 = vmatpush3.bf16.msra.mxu1 %v1629_v53  ;;  %v1673_v39 = vpack.c.bf16 %v696_v33, %v695_v32  ;;  %v708_v32 = vld [vmem:[#allocation10 + $0x78] sm:$0xff] }
  0x8e   :  { %1638 = vmatprep.subr.bf16.mxu0 %v1637_v45  ;;  %1634 = vmatprep.subr.bf16.mxu1 %v1633_v20 }
  0x90   :  { %1326 = vmatmul.mubr.f32.vlgmr.msra.gmra.mrb[0].mxu0 %v126_v50  ;;  %v699_v50 = vld [vmem:[#allocation10 + $0x30] sm:$0xff] }
  0x91   :  { %1328 = vmatprep.mubr.f32.mxu0 %v127_v51  ;;  %1640 = vmatpush3.bf16.msra.mxu0 %v1637_v45  ;;  %v700_v51 = vld [vmem:[#allocation10 + $0x38] sm:$0xff] }
  0x92   :  { %1642 = vmatprep.subr.bf16.mxu0 %v1641_v52  ;;  %1636 = vmatpush3.bf16.msra.mxu1 %v1633_v20 }
  0x93   :  { %1670 = vmatprep.subr.bf16.mxu1 %v1669_v26 }
  0x94   :  { %1329 = vmatmul.mubr.f32.gmra.mrb[2].mxu0 %v128_v56 }
  0x95   :  { %1331 = vmatprep.mubr.f32.mxu0 %v129_v57  ;;  %1644 = vmatpush3.bf16.msra.mxu0 %v1641_v52  ;;  %v1681_v57 = vpack.c.bf16 %v700_v51, %v699_v50  ;;  %v889_v51 = vld [vmem:[#allocation11 + $0x60] sm:$0xff] }
  0x96   :  { %1646 = vmatprep.subr.bf16.mxu0 %v1645_v58 }
  0x98   :  { %1332 = vmatmul.mubr.f32.gmra.mrb[4].mxu0 %v130_v61 }
  0x99   :  { %1334 = vmatprep.mubr.f32.mxu0 %v131_v62  ;;  %1648 = vmatpush3.bf16.msra.mxu0 %v1645_v58 }
  0x9a   :  { %1650 = vmatprep.subr.bf16.mxu0 %v1649_v63 }
  0x9c   :  { %1335 = vmatmul.mubr.f32.gmra.mrb[6].mxu0 %v132_v2  ;;  %v1685_v2 = vpack.c.bf16 %v702_v60, %v701_v59 }
  0x9d   :  { %1337 = vmatprep.mubr.f32.mxu0 %v133_v3  ;;  %1652 = vmatpush3.bf16.msra.mxu0 %v1649_v63 }
  0x9e   :  { %1654 = vmatprep.subr.bf16.mxu0 %v1653_v4 }
  0xa0   :  { %1338 = vmatmul.mubr.f32.gmra.mrb[8].mxu0 %v134_v7 }
  0xa1   :  { %1340 = vmatprep.mubr.f32.mxu0 %v135_v8  ;;  %1656 = vmatpush3.bf16.msra.mxu0 %v1653_v4  ;;  %v703_v4 = vld [vmem:[#allocation10 + $0x50] sm:$0xff] }
  0xa2   :  { %1658 = vmatprep.subr.bf16.mxu0 %v1657_v9  ;;  %v1689_v11 = vpack.c.bf16 %v704_v5, %v703_v4 }
  0xa4   :  { %1341 = vmatmul.mubr.f32.gmra.mrb[10].mxu0 %v136_v12 }
  0xa5   :  { %1343 = vmatprep.mubr.f32.mxu0 %v137_v13  ;;  %1660 = vmatpush3.bf16.msra.mxu0 %v1657_v9  ;;  %v705_v13 = vld [vmem:[#allocation10 + $0x60] sm:$0xff] }
  0xa6   :  { %1662 = vmatprep.subr.bf16.mxu0 %v1661_v14 }
  0xa8   :  { %1344 = vmatmul.mubr.f32.gmra.mrb[12].mxu0 %v138_v15 }
  0xa9   :  { %1346 = vmatprep.mubr.f32.mxu0 %v139_v16  ;;  %1664 = vmatpush3.bf16.msra.mxu0 %v1661_v14  ;;  %v706_v14 = vld [vmem:[#allocation10 + $0x68] sm:$0xff] }
  0xaa   :  { %1666 = vmatprep.subr.bf16.mxu0 %v1665_v23  ;;  %v1693_v20 = vpack.c.bf16 %v706_v14, %v705_v13 }
  0xac   :  { %1347 = vmatmul.mubr.f32.gmra.mrb[14].mxu0 %v140_v17 }
  0xad   :  { %1668 = vmatpush3.bf16.msra.mxu0 %v1665_v23 }
 0x163   :  { %v1327_v28 = vpop.f32.mrb[0].mxu0 }
 0x164   :  { %v236_v29 = vadd.f32 %v1327_v28, %v2197_v27  ;;  %v230_v30 = vpop.f32.mrb[1].mxu0 }
 0x165   :  { %v231_v31 = vadd.f32 %v2197_v27, %v230_v30 }
 0x166   :  { %v310_v36 = vmax.f32 %v236_v29, 0.0 }
 0x167   :  { %v309_v34 = vmax.f32 %v231_v31, 0.0  ;;  %v1330_v35 = vpop.f32.mrb[2].mxu0  ;;  %v707_v31 = vld [vmem:[#allocation10 + $0x70] sm:$0xff] }
 0x168   :  { %v246_v37 = vadd.f32 %v1330_v35, %v2197_v27  ;;  %v240_v38 = vpop.f32.mrb[3].mxu0  ;;  %v1697_v33 = vpack.c.bf16 %v708_v32, %v707_v31  ;;  %v878_v35 = vld [vmem:[#allocation11 + $0x8] sm:$0xff] }
 0x169   :  { %v241_v40 = vadd.f32 %v2197_v27, %v240_v38  ;;  %1381 = vmatprep.mubr.f32.mxu1 %v309_v34  ;;  %1437 = vmatprep.mubr.f32.mxu0 %v309_v34  ;;  %v877_v34 = vld [vmem:[#allocation11] sm:$0xff] }
 0x16a   :  { %1382 = vmatmul.mubr.f32.vlgmr.msra.gmra.mrb[0].mxu1 %v310_v36  ;;  %1438 = vmatmul.mubr.f32.vlgmr.msra.gmra.mrb[16].mxu0 %v310_v36  ;;  %v312_v45 = vmax.f32 %v246_v37, 0.0  ;;  %v879_v36 = vld [vmem:[#allocation11 + $0x10] sm:$0xff]  ;;  %v880_v37 = vld [vmem:[#allocation11 + $0x18] sm:$0xff] }
 0x16b   :  { %v311_v43 = vmax.f32 %v241_v40, 0.0  ;;  %v1333_v44 = vpop.f32.mrb[4].mxu0  ;;  %1672 = vmatpush3.bf16.msra.mxu1 %v1669_v26  ;;  %v2215_v38 = vpack.c.bf16 %v880_v37, %v879_v36  ;;  %v882_v40 = vld [vmem:[#allocation11 + $0x28] sm:$0xff] }
 0x16c   :  { %v256_v46 = vadd.f32 %v1333_v44, %v2197_v27  ;;  %v250_v47 = vpop.f32.mrb[5].mxu0  ;;  %1674 = vmatprep.subr.bf16.mxu1 %v1673_v39 }
 0x16d   :  { %v251_v49 = vadd.f32 %v2197_v27, %v250_v47  ;;  %1384 = vmatprep.mubr.f32.mxu1 %v311_v43  ;;  %1440 = vmatprep.mubr.f32.mxu0 %v311_v43  ;;  %v884_v43 = vld [vmem:[#allocation11 + $0x38] sm:$0xff] }
 0x16e   :  { %1385 = vmatmul.mubr.f32.gmra.mrb[2].mxu1 %v312_v45  ;;  %1441 = vmatmul.mubr.f32.gmra.mrb[18].mxu0 %v312_v45  ;;  %v314_v54 = vmax.f32 %v256_v46, 0.0  ;;  %v2222_v44 = vpack.c.bf16 %v884_v43, %v883_v42  ;;  %v885_v45 = vld [vmem:[#allocation11 + $0x40] sm:$0xff]  ;;  %v886_v46 = vld [vmem:[#allocation11 + $0x48] sm:$0xff] }
 0x16f   :  { %v313_v52 = vmax.f32 %v251_v49, 0.0  ;;  %v1336_v53 = vpop.f32.mrb[6].mxu0  ;;  %1676 = vmatpush3.bf16.msra.mxu1 %v1673_v39  ;;  %v881_v39 = vld [vmem:[#allocation11 + $0x20] sm:$0xff]  ;;  %v2226_v47 = vpack.c.bf16 %v886_v46, %v885_v45  ;;  %v888_v49 = vld [vmem:[#allocation11 + $0x58] sm:$0xff] }
 0x170   :  { %v266_v55 = vadd.f32 %v1336_v53, %v2197_v27  ;;  %v260_v56 = vpop.f32.mrb[7].mxu0  ;;  %1678 = vmatprep.subr.bf16.mxu1 %v1677_v48  ;;  %v2218_v41 = vpack.c.bf16 %v882_v40, %v881_v39 }
 0x171   :  { %v261_v58 = vadd.f32 %v2197_v27, %v260_v56  ;;  %1387 = vmatprep.mubr.f32.mxu1 %v313_v52  ;;  %1443 = vmatprep.mubr.f32.mxu0 %v313_v52  ;;  %v890_v52 = vld [vmem:[#allocation11 + $0x68] sm:$0xff] }
 0x172   :  { %1388 = vmatmul.mubr.f32.gmra.mrb[4].mxu1 %v314_v54  ;;  %1444 = vmatmul.mubr.f32.gmra.mrb[20].mxu0 %v314_v54  ;;  %v316_v63 = vmax.f32 %v266_v55, 0.0  ;;  %v2234_v53 = vpack.c.bf16 %v890_v52, %v889_v51  ;;  %v2242_v54 = vld [vmem:[%s2366_s4] ss:$0 sm:$0xff] }
 0x173   :  { %v315_v61 = vmax.f32 %v261_v58, 0.0  ;;  %v1339_v62 = vpop.f32.mrb[8].mxu0  ;;  %1680 = vmatpush3.bf16.msra.mxu1 %v1677_v48  ;;  %v887_v48 = vld [vmem:[#allocation11 + $0x50] sm:$0xff]  ;;  %v2247_v55 = vld [vmem:[%s2368_s6] ss:$0 sm:$0xff] }
 0x174   :  { %v276_v0 = vadd.f32 %v1339_v62, %v2197_v27  ;;  %v270_v1 = vpop.f32.mrb[9].mxu0  ;;  %1682 = vmatprep.subr.bf16.mxu1 %v1681_v57  ;;  %v2230_v50 = vpack.c.bf16 %v888_v49, %v887_v48 }
 0x175   :  { %v271_v3 = vadd.f32 %v2197_v27, %v270_v1  ;;  %1390 = vmatprep.mubr.f32.mxu1 %v315_v61  ;;  %1446 = vmatprep.mubr.f32.mxu0 %v315_v61 }
 0x176   :  { %1391 = vmatmul.mubr.f32.gmra.mrb[6].mxu1 %v316_v63  ;;  %1447 = vmatmul.mubr.f32.gmra.mrb[22].mxu0 %v316_v63  ;;  %v318_v8 = vmax.f32 %v276_v0, 0.0 }
 0x177   :  { %v317_v6 = vmax.f32 %v271_v3, 0.0  ;;  %v1342_v7 = vpop.f32.mrb[10].mxu0  ;;  %1684 = vmatpush3.bf16.msra.mxu1 %v1681_v57 }
 0x178   :  { %v286_v9 = vadd.f32 %v1342_v7, %v2197_v27  ;;  %v280_v10 = vpop.f32.mrb[11].mxu0  ;;  %1686 = vmatprep.subr.bf16.mxu1 %v1685_v2 }
 0x179   :  { %v281_v12 = vadd.f32 %v2197_v27, %v280_v10  ;;  %1393 = vmatprep.mubr.f32.mxu1 %v317_v6  ;;  %1449 = vmatprep.mubr.f32.mxu0 %v317_v6 }
 0x17a   :  { %1394 = vmatmul.mubr.f32.gmra.mrb[8].mxu1 %v318_v8  ;;  %1450 = vmatmul.mubr.f32.gmra.mrb[24].mxu0 %v318_v8  ;;  %v320_v17 = vmax.f32 %v286_v9, 0.0 }
 0x17b   :  { %v319_v15 = vmax.f32 %v281_v12, 0.0  ;;  %v1345_v16 = vpop.f32.mrb[12].mxu0  ;;  %1688 = vmatpush3.bf16.msra.mxu1 %v1685_v2 }
 0x17c   :  { %v296_v18 = vadd.f32 %v1345_v16, %v2197_v27  ;;  %v290_v19 = vpop.f32.mrb[13].mxu0  ;;  %1690 = vmatprep.subr.bf16.mxu1 %v1689_v11 }
 0x17d   :  { %v291_v21 = vadd.f32 %v2197_v27, %v290_v19  ;;  %1396 = vmatprep.mubr.f32.mxu1 %v319_v15  ;;  %1452 = vmatprep.mubr.f32.mxu0 %v319_v15 }
 0x17e   :  { %1397 = vmatmul.mubr.f32.gmra.mrb[10].mxu1 %v320_v17  ;;  %1453 = vmatmul.mubr.f32.gmra.mrb[26].mxu0 %v320_v17  ;;  %v322_v24 = vmax.f32 %v296_v18, 0.0 }
 0x17f   :  { %v321_v22 = vmax.f32 %v291_v21, 0.0  ;;  %v1348_v23 = vpop.f32.mrb[14].mxu0  ;;  %1692 = vmatpush3.bf16.msra.mxu1 %v1689_v11 }
 0x180   :  { %v306_v25 = vadd.f32 %v1348_v23, %v2197_v27  ;;  %v300_v26 = vpop.f32.mrb[15].mxu0  ;;  %1694 = vmatprep.subr.bf16.mxu1 %v1693_v20 }
 0x181   :  { %v301_v28 = vadd.f32 %v2197_v27, %v300_v26  ;;  %1399 = vmatprep.mubr.f32.mxu1 %v321_v22  ;;  %1455 = vmatprep.mubr.f32.mxu0 %v321_v22  ;;  %v1701_v27 = vpack.c.bf16 %v878_v35, %v877_v34 }
 0x182   :  { %1400 = vmatmul.mubr.f32.gmra.mrb[12].mxu1 %v322_v24  ;;  %1456 = vmatmul.mubr.f32.gmra.mrb[28].mxu0 %v322_v24  ;;  %v324_v30 = vmax.f32 %v306_v25, 0.0 }
 0x183   :  { %v323_v29 = vmax.f32 %v301_v28, 0.0  ;;  %1696 = vmatpush3.bf16.msra.mxu1 %v1693_v20  ;;  %1702 = vmatprep.subr.bf16.mxu0 %v1701_v27 }
 0x184   :  { %1698 = vmatprep.subr.bf16.mxu1 %v1697_v33  ;;  %1704 = vmatpush3.bf16.msra.mxu0 %v1701_v27 }
 0x185   :  { %1402 = vmatprep.mubr.f32.mxu1 %v323_v29  ;;  %1458 = vmatprep.mubr.f32.mxu0 %v323_v29 }
 0x186   :  { %1403 = vmatmul.mubr.f32.gmra.mrb[14].mxu1 %v324_v30  ;;  %1459 = vmatmul.mubr.f32.gmra.mrb[30].mxu0 %v324_v30 }
 0x187   :  { %1700 = vmatpush3.bf16.msra.mxu1 %v1697_v33  ;;  %1706 = vmatprep.subr.bf16.mxu0 %v2215_v38 }
 0x188   :  { %1733 = vmatprep.subr.bf16.mxu1 %v1701_v27  ;;  %1708 = vmatpush3.bf16.msra.mxu0 %v2215_v38 }
 0x189   :  { %1710 = vmatprep.subr.bf16.mxu0 %v2218_v41 }
 0x18c   :  { %1712 = vmatpush3.bf16.msra.mxu0 %v2218_v41 }
 0x18d   :  { %1714 = vmatprep.subr.bf16.mxu0 %v2222_v44 }
 0x190   :  { %1716 = vmatpush3.bf16.msra.mxu0 %v2222_v44 }
 0x191   :  { %1718 = vmatprep.subr.bf16.mxu0 %v2226_v47 }
 0x194   :  { %1720 = vmatpush3.bf16.msra.mxu0 %v2226_v47 }
 0x195   :  { %1722 = vmatprep.subr.bf16.mxu0 %v2230_v50 }
 0x198   :  { %1724 = vmatpush3.bf16.msra.mxu0 %v2230_v50 }
 0x199   :  { %1726 = vmatprep.subr.bf16.mxu0 %v2234_v53 }
 0x19c   :  { %1728 = vmatpush3.bf16.msra.mxu0 %v2234_v53 }
 0x23d   :  { %v1383_v56 = vpop.f32.mrb[0].mxu1  ;;  %v1439_v57 = vpop.f32.mrb[16].mxu0 }
 0x23e   :  { %v420_v58 = vadd.f32 %v1383_v56, %v2242_v54  ;;  %v588_v59 = vadd.f32 %v1439_v57, %v2247_v55  ;;  %v414_v60 = vpop.f32.mrb[1].mxu1  ;;  %v582_v61 = vpop.f32.mrb[17].mxu0 }
 0x23f   :  { %v415_v62 = vadd.f32 %v2242_v54, %v414_v60  ;;  %v583_v63 = vadd.f32 %v2247_v55, %v582_v61  ;;  %v892_v60 = vld [vmem:[#allocation11 + $0x78] sm:$0xff] }
 0x240   :  { %662 = vst [vmem:[#allocation14 + $0x8] sm:$0xff] %v420_v58  ;;  %678 = vst [vmem:[#allocation16 + $0x8] sm:$0xff] %v588_v59  ;;  %v891_v59 = vld [vmem:[#allocation11 + $0x70] sm:$0xff] }
 0x241   :  { %661 = vst [vmem:[#allocation14] sm:$0xff] %v415_v62  ;;  %677 = vst [vmem:[#allocation16] sm:$0xff] %v583_v63  ;;  %v1386_v0 = vpop.f32.mrb[2].mxu1  ;;  %v1442_v1 = vpop.f32.mrb[18].mxu0  ;;  %1493 = vmatprep.mubr.f32.mxu1 %v415_v62  ;;  %v1729_v61 = vpack.c.bf16 %v892_v60, %v891_v59 }
 0x242   :  { %v430_v2 = vadd.f32 %v1386_v0, %v2242_v54  ;;  %v598_v3 = vadd.f32 %v1442_v1, %v2247_v55  ;;  %v424_v4 = vpop.f32.mrb[3].mxu1  ;;  %v592_v5 = vpop.f32.mrb[19].mxu0  ;;  %1494 = vmatmul.mubr.f32.vlgmr.msra.gmra.mrb[16].mxu1 %v420_v58 }
 0x243   :  { %v425_v6 = vadd.f32 %v2242_v54, %v424_v4  ;;  %v593_v7 = vadd.f32 %v2247_v55, %v592_v5  ;;  %1741 = vmatpush3.bf16.msra.mxu1 %v1701_v27  ;;  %1730 = vmatprep.subr.bf16.mxu0 %v1729_v61 }
 0x244   :  { %664 = vst [vmem:[#allocation14 + $0x18] sm:$0xff] %v430_v2  ;;  %680 = vst [vmem:[#allocation16 + $0x18] sm:$0xff] %v598_v3  ;;  %1734 = vmatprep.subr.bf16.mxu1 %v2215_v38  ;;  %1732 = vmatpush3.bf16.msra.mxu0 %v1729_v61 }
 0x245   :  { %663 = vst [vmem:[#allocation14 + $0x10] sm:$0xff] %v425_v6  ;;  %679 = vst [vmem:[#allocation16 + $0x10] sm:$0xff] %v593_v7  ;;  %v1389_v8 = vpop.f32.mrb[4].mxu1  ;;  %v1445_v9 = vpop.f32.mrb[20].mxu0  ;;  %1496 = vmatprep.mubr.f32.mxu1 %v425_v6 }
 0x246   :  { %v440_v10 = vadd.f32 %v1389_v8, %v2242_v54  ;;  %v608_v11 = vadd.f32 %v1445_v9, %v2247_v55  ;;  %v434_v12 = vpop.f32.mrb[5].mxu1  ;;  %v602_v13 = vpop.f32.mrb[21].mxu0  ;;  %1497 = vmatmul.mubr.f32.gmra.mrb[18].mxu1 %v430_v2 }
 0x247   :  { %v435_v14 = vadd.f32 %v2242_v54, %v434_v12  ;;  %v603_v15 = vadd.f32 %v2247_v55, %v602_v13  ;;  %1742 = vmatpush3.bf16.msra.mxu1 %v2215_v38 }
 0x248   :  { %666 = vst [vmem:[#allocation14 + $0x28] sm:$0xff] %v440_v10  ;;  %682 = vst [vmem:[#allocation16 + $0x28] sm:$0xff] %v608_v11  ;;  %1735 = vmatprep.subr.bf16.mxu1 %v2218_v41 }
 0x249   :  { %665 = vst [vmem:[#allocation14 + $0x20] sm:$0xff] %v435_v14  ;;  %681 = vst [vmem:[#allocation16 + $0x20] sm:$0xff] %v603_v15  ;;  %v1392_v16 = vpop.f32.mrb[6].mxu1  ;;  %v1448_v17 = vpop.f32.mrb[22].mxu0  ;;  %1499 = vmatprep.mubr.f32.mxu1 %v435_v14 }
 0x24a   :  { %v450_v18 = vadd.f32 %v1392_v16, %v2242_v54  ;;  %v618_v19 = vadd.f32 %v1448_v17, %v2247_v55  ;;  %v444_v20 = vpop.f32.mrb[7].mxu1  ;;  %v612_v21 = vpop.f32.mrb[23].mxu0  ;;  %1500 = vmatmul.mubr.f32.gmra.mrb[20].mxu1 %v440_v10 }
 0x24b   :  { %v445_v22 = vadd.f32 %v2242_v54, %v444_v20  ;;  %v613_v23 = vadd.f32 %v2247_v55, %v612_v21  ;;  %1743 = vmatpush3.bf16.msra.mxu1 %v2218_v41 }
 0x24c   :  { %668 = vst [vmem:[#allocation14 + $0x38] sm:$0xff] %v450_v18  ;;  %684 = vst [vmem:[#allocation16 + $0x38] sm:$0xff] %v618_v19  ;;  %1736 = vmatprep.subr.bf16.mxu1 %v2222_v44 }
 0x24d   :  { %667 = vst [vmem:[#allocation14 + $0x30] sm:$0xff] %v445_v22  ;;  %683 = vst [vmem:[#allocation16 + $0x30] sm:$0xff] %v613_v23  ;;  %v1395_v24 = vpop.f32.mrb[8].mxu1  ;;  %v1451_v25 = vpop.f32.mrb[24].mxu0  ;;  %1502 = vmatprep.mubr.f32.mxu1 %v445_v22 }
 0x24e   :  { %v460_v26 = vadd.f32 %v1395_v24, %v2242_v54  ;;  %v628_v28 = vadd.f32 %v1451_v25, %v2247_v55  ;;  %v454_v29 = vpop.f32.mrb[9].mxu1  ;;  %v622_v30 = vpop.f32.mrb[25].mxu0  ;;  %1503 = vmatmul.mubr.f32.gmra.mrb[22].mxu1 %v450_v18 }
 0x24f   :  { %v455_v31 = vadd.f32 %v2242_v54, %v454_v29  ;;  %v623_v32 = vadd.f32 %v2247_v55, %v622_v30  ;;  %1744 = vmatpush3.bf16.msra.mxu1 %v2222_v44 }
 0x250   :  { %670 = vst [vmem:[#allocation14 + $0x48] sm:$0xff] %v460_v26  ;;  %686 = vst [vmem:[#allocation16 + $0x48] sm:$0xff] %v628_v28  ;;  %1737 = vmatprep.subr.bf16.mxu1 %v2226_v47 }
 0x251   :  { %669 = vst [vmem:[#allocation14 + $0x40] sm:$0xff] %v455_v31  ;;  %685 = vst [vmem:[#allocation16 + $0x40] sm:$0xff] %v623_v32  ;;  %v1398_v33 = vpop.f32.mrb[10].mxu1  ;;  %v1454_v34 = vpop.f32.mrb[26].mxu0  ;;  %1505 = vmatprep.mubr.f32.mxu1 %v455_v31 }
 0x252   :  { %v470_v35 = vadd.f32 %v1398_v33, %v2242_v54  ;;  %v638_v36 = vadd.f32 %v1454_v34, %v2247_v55  ;;  %v464_v27 = vpop.f32.mrb[11].mxu1  ;;  %v632_v37 = vpop.f32.mrb[27].mxu0  ;;  %1506 = vmatmul.mubr.f32.gmra.mrb[24].mxu1 %v460_v26 }
 0x253   :  { %v465_v38 = vadd.f32 %v2242_v54, %v464_v27  ;;  %v633_v39 = vadd.f32 %v2247_v55, %v632_v37  ;;  %1745 = vmatpush3.bf16.msra.mxu1 %v2226_v47 }
 0x254   :  { %672 = vst [vmem:[#allocation14 + $0x58] sm:$0xff] %v470_v35  ;;  %688 = vst [vmem:[#allocation16 + $0x58] sm:$0xff] %v638_v36  ;;  %1738 = vmatprep.subr.bf16.mxu1 %v2230_v50 }
 0x255   :  { %671 = vst [vmem:[#allocation14 + $0x50] sm:$0xff] %v465_v38  ;;  %687 = vst [vmem:[#allocation16 + $0x50] sm:$0xff] %v633_v39  ;;  %v1401_v40 = vpop.f32.mrb[12].mxu1  ;;  %v1457_v41 = vpop.f32.mrb[28].mxu0  ;;  %1508 = vmatprep.mubr.f32.mxu1 %v465_v38 }
 0x256   :  { %v480_v42 = vadd.f32 %v1401_v40, %v2242_v54  ;;  %v648_v43 = vadd.f32 %v1457_v41, %v2247_v55  ;;  %v474_v44 = vpop.f32.mrb[13].mxu1  ;;  %v642_v45 = vpop.f32.mrb[29].mxu0  ;;  %1509 = vmatmul.mubr.f32.gmra.mrb[26].mxu1 %v470_v35 }
 0x257   :  { %v475_v46 = vadd.f32 %v2242_v54, %v474_v44  ;;  %v643_v47 = vadd.f32 %v2247_v55, %v642_v45  ;;  %1746 = vmatpush3.bf16.msra.mxu1 %v2230_v50 }
 0x258   :  { %674 = vst [vmem:[#allocation14 + $0x68] sm:$0xff] %v480_v42  ;;  %690 = vst [vmem:[#allocation16 + $0x68] sm:$0xff] %v648_v43  ;;  %1739 = vmatprep.subr.bf16.mxu1 %v2234_v53 }
 0x259   :  { %673 = vst [vmem:[#allocation14 + $0x60] sm:$0xff] %v475_v46  ;;  %689 = vst [vmem:[#allocation16 + $0x60] sm:$0xff] %v643_v47  ;;  %v1404_v48 = vpop.f32.mrb[14].mxu1  ;;  %v1460_v49 = vpop.f32.mrb[30].mxu0  ;;  %1511 = vmatprep.mubr.f32.mxu1 %v475_v46 }
 0x25a   :  { %v490_v51 = vadd.f32 %v1404_v48, %v2242_v54  ;;  %v658_v52 = vadd.f32 %v1460_v49, %v2247_v55  ;;  %v484_v56 = vpop.f32.mrb[15].mxu1  ;;  %v652_v57 = vpop.f32.mrb[31].mxu0  ;;  %1512 = vmatmul.mubr.f32.gmra.mrb[28].mxu1 %v480_v42 }
 0x25b   :  { %v485_v58 = vadd.f32 %v2242_v54, %v484_v56  ;;  %v653_v50 = vadd.f32 %v2247_v55, %v652_v57  ;;  %1747 = vmatpush3.bf16.msra.mxu1 %v2234_v53  ;;  %v1131_v54 = vld [vmem:[%s2370_s8] ss:$0 sm:$0xff]  ;;  %s2010_s8 = smov [#allocation14]  }
 0x25c   :  { %676 = vst [vmem:[#allocation14 + $0x78] sm:$0xff] %v490_v51  ;;  %692 = vst [vmem:[#allocation16 + $0x78] sm:$0xff] %v658_v52  ;;  %1740 = vmatprep.subr.bf16.mxu1 %v1729_v61  ;;  %s1094_s1 = sshll.u32 %s2010_s8, 4  ;;  %s1095_s1 = int_to_ptr.vmem [resolvable:$true] %s1094_s1 }
 0x25d   :  { %675 = vst [vmem:[#allocation14 + $0x70] sm:$0xff] %v485_v58  ;;  %691 = vst [vmem:[#allocation16 + $0x70] sm:$0xff] %v653_v50  ;;  %1514 = vmatprep.mubr.f32.mxu1 %v485_v58  ;;  %s1924_s26 = scalar_lea.vmem %s1095_s1, 2048  ;;  %p1929_p7 = scmp.lt.s32.totalorder %s1095_s1, %s1095_s1 }
 0x25e   :  { %1515 = vmatmul.mubr.f32.gmra.mrb[30].mxu1 %v490_v51  ;;  %p1925_p6 = scmp.ne.s32.totalorder %s1095_s1, %s1924_s26  ;;  %p1930_p8 = scmp.lt.s32.totalorder %s1924_s26, %s1924_s26 }
 0x25f   :  { %1748 = vmatpush3.bf16.msra.mxu1 %v1729_v61 }
 0x260   :  { %p1931_p9 = por %p1930_p8, %p1929_p7 }
 0x262   :  { %p1932_p10 = pnand %p1931_p9, %p1925_p6 }
 0x315   :  { %v1495_v55 = vpop.f32.mrb[16].mxu1 }
 0x316   :  { %v788_v62 = vadd.f32 %v1495_v55, %v1131_v54  ;;  %v782_v53 = vpop.f32.mrb[17].mxu1 }
 0x317   :  { %v783_v63 = vadd.f32 %v1131_v54, %v782_v53 }
 0x318   :  { %v862_v2 = vmax.f32 %v788_v62, 0.0 }
 0x319   :  { %v861_v0 = vmax.f32 %v783_v63, 0.0  ;;  %v1498_v1 = vpop.f32.mrb[18].mxu1 }
 0x31a   :  { %v798_v3 = vadd.f32 %v1498_v1, %v1131_v54  ;;  %v792_v4 = vpop.f32.mrb[19].mxu1 }
 0x31b   :  { %v793_v5 = vadd.f32 %v1131_v54, %v792_v4  ;;  %1549 = vmatprep.mubr.f32.mxu0 %v861_v0 }
 0x31c   :  { %1550 = vmatmul.mubr.f32.vlgmr.msra.gmra.mrb[32].mxu0 %v862_v2  ;;  %v864_v8 = vmax.f32 %v798_v3, 0.0 }
 0x31d   :  { %v863_v6 = vmax.f32 %v793_v5, 0.0  ;;  %v1501_v7 = vpop.f32.mrb[20].mxu1 }
 0x31e   :  { %v808_v9 = vadd.f32 %v1501_v7, %v1131_v54  ;;  %v802_v10 = vpop.f32.mrb[21].mxu1 }
 0x31f   :  { %v803_v11 = vadd.f32 %v1131_v54, %v802_v10  ;;  %1552 = vmatprep.mubr.f32.mxu0 %v863_v6 }
 0x320   :  { %1553 = vmatmul.mubr.f32.gmra.mrb[34].mxu0 %v864_v8  ;;  %v866_v14 = vmax.f32 %v808_v9, 0.0 }
 0x321   :  { %v865_v12 = vmax.f32 %v803_v11, 0.0  ;;  %v1504_v13 = vpop.f32.mrb[22].mxu1 }
 0x322   :  { %v818_v15 = vadd.f32 %v1504_v13, %v1131_v54  ;;  %v812_v16 = vpop.f32.mrb[23].mxu1 }
 0x323   :  { %v813_v17 = vadd.f32 %v1131_v54, %v812_v16  ;;  %1555 = vmatprep.mubr.f32.mxu0 %v865_v12 }
 0x324   :  { %1556 = vmatmul.mubr.f32.gmra.mrb[36].mxu0 %v866_v14  ;;  %v868_v20 = vmax.f32 %v818_v15, 0.0 }
 0x325   :  { %v867_v18 = vmax.f32 %v813_v17, 0.0  ;;  %v1507_v19 = vpop.f32.mrb[24].mxu1 }
 0x326   :  { %v828_v21 = vadd.f32 %v1507_v19, %v1131_v54  ;;  %v822_v22 = vpop.f32.mrb[25].mxu1 }
 0x327   :  { %v823_v23 = vadd.f32 %v1131_v54, %v822_v22  ;;  %1558 = vmatprep.mubr.f32.mxu0 %v867_v18 }
 0x328   :  { %1559 = vmatmul.mubr.f32.gmra.mrb[38].mxu0 %v868_v20  ;;  %v870_v26 = vmax.f32 %v828_v21, 0.0 }
 0x329   :  { %v869_v24 = vmax.f32 %v823_v23, 0.0  ;;  %v1510_v25 = vpop.f32.mrb[26].mxu1 }
 0x32a   :  { %v838_v28 = vadd.f32 %v1510_v25, %v1131_v54  ;;  %v832_v29 = vpop.f32.mrb[27].mxu1 }
 0x32b   :  { %v833_v30 = vadd.f32 %v1131_v54, %v832_v29  ;;  %1561 = vmatprep.mubr.f32.mxu1 %v869_v24 }
 0x32c   :  { %1562 = vmatmul.mubr.f32.vlgmr.msra.gmra.mrb[32].mxu1 %v870_v26  ;;  %v872_v33 = vmax.f32 %v838_v28, 0.0 }
 0x32d   :  { %v871_v31 = vmax.f32 %v833_v30, 0.0  ;;  %v1513_v32 = vpop.f32.mrb[28].mxu1 }
 0x32e   :  { %v848_v34 = vadd.f32 %v1513_v32, %v1131_v54  ;;  %v842_v35 = vpop.f32.mrb[29].mxu1 }
 0x32f   :  { %v843_v36 = vadd.f32 %v1131_v54, %v842_v35  ;;  %1564 = vmatprep.mubr.f32.mxu1 %v871_v31 }
 0x330   :  { %1565 = vmatmul.mubr.f32.gmra.mrb[34].mxu1 %v872_v33  ;;  %v874_v38 = vmax.f32 %v848_v34, 0.0 }
 0x331   :  { %v873_v27 = vmax.f32 %v843_v36, 0.0  ;;  %v1516_v37 = vpop.f32.mrb[30].mxu1 }
 0x332   :  { %v858_v39 = vadd.f32 %v1516_v37, %v1131_v54  ;;  %v852_v40 = vpop.f32.mrb[31].mxu1 }
 0x333   :  { %v853_v41 = vadd.f32 %v1131_v54, %v852_v40  ;;  %1567 = vmatprep.mubr.f32.mxu1 %v873_v27 }
 0x334   :  { %1568 = vmatmul.mubr.f32.gmra.mrb[36].mxu1 %v874_v38  ;;  %v876_v43 = vmax.f32 %v858_v39, 0.0 }
 0x335   :  { %v875_v42 = vmax.f32 %v853_v41, 0.0 }
 0x337   :  { %1570 = vmatprep.mubr.f32.mxu1 %v875_v42 }
 0x338   :  { %1571 = vmatmul.mubr.f32.gmra.mrb[38].mxu1 %v876_v43 }
 0x339   :  { %1935 = shalt.err (!%p1932_p10)
}
 0x33a   :  { %s1936_s22 = scalar_lea.hbm %s2374_s12, 2048 }
 0x33b   :  { %p1937_p11 = scmp.ne.s32.totalorder %s2374_s12, %s1936_s22  ;;  %p1940_p12 = scmp.lt.u32.totalorder %s1936_s22, %s2374_s12 }
 0x33d   :  { %p1942_p13 = pnand %p1940_p12, %p1937_p11 }
 0x33f   :  { %1945 = shalt.err (!%p1942_p13)
}
 0x340   :  { %1100 = dma.vmem_to_hbm [thread:$0]  %s1095_s1, 2048, %s2374_s12, [#allocation15], %s2004_s20, %s2004_s20, %s2005_s21  }
 0x341   :  { %s2011_s27 = smov [#allocation16]  }
 0x342   :  { %s1106_s30 = sshll.u32 %s2011_s27, 4  ;;  %s1107_s30 = int_to_ptr.vmem [resolvable:$true] %s1106_s30 }
 0x343   :  { %s1946_s5 = scalar_lea.vmem %s1107_s30, 2048  ;;  %p1951_p1 = scmp.lt.s32.totalorder %s1107_s30, %s1107_s30 }
 0x344   :  { %p1947_p0 = scmp.ne.s32.totalorder %s1107_s30, %s1946_s5  ;;  %p1952_p2 = scmp.lt.s32.totalorder %s1946_s5, %s1946_s5 }
 0x346   :  { %p1953_p3 = por %p1952_p2, %p1951_p1 }
 0x348   :  { %p1954_p4 = pnand %p1953_p3, %p1947_p0 }
 0x34a   :  { %1957 = shalt.err (!%p1954_p4)
}
 0x34b   :  { %s1958_s9 = scalar_lea.hbm %s2375_s13, 2048 }
 0x34c   :  { %p1959_p5 = scmp.ne.s32.totalorder %s2375_s13, %s1958_s9  ;;  %p1962_p6 = scmp.lt.u32.totalorder %s1958_s9, %s2375_s13 }
 0x34e   :  { %p1964_p7 = pnand %p1962_p6, %p1959_p5 }
 0x350   :  { %1967 = shalt.err (!%p1964_p7)
}
 0x351   :  { %1112 = dma.vmem_to_hbm [thread:$0]  %s1107_s30, 2048, %s2375_s13, [#allocation15], %s2004_s20, %s2004_s20, %s2005_s21  }
 0x352   :  { %v2329_v44 = vld [vmem:[%s2372_s10] ss:$0 sm:$0xff]  ;;  %s2012_s10 = smov [#allocation13]  }
 0x353   :  { %s1082_s13 = sshll.u32 %s2012_s10, 4  ;;  %s1083_s13 = int_to_ptr.vmem [resolvable:$true] %s1082_s13 }
 0x354   :  { %s1968_s8 = scalar_lea.vmem %s1083_s13, 2048  ;;  %p1973_p9 = scmp.lt.s32.totalorder %s1083_s13, %s1083_s13 }
 0x355   :  { %p1969_p8 = scmp.ne.s32.totalorder %s1083_s13, %s1968_s8  ;;  %p1974_p10 = scmp.lt.s32.totalorder %s1968_s8, %s1968_s8 }
 0x357   :  { %p1975_p11 = por %p1974_p10, %p1973_p9 }
 0x359   :  { %p1976_p12 = pnand %p1975_p11, %p1969_p8 }
 0x3ef   :  { %v1551_v45 = vpop.f32.mrb[32].mxu0 }
 0x3f0   :  { %v972_v46 = vadd.f32 %v1551_v45, %v2329_v44  ;;  %v966_v47 = vpop.f32.mrb[33].mxu0 }
 0x3f1   :  { %v967_v48 = vadd.f32 %v2329_v44, %v966_v47 }
 0x3f2   :  { %1760 = vtanh.f32 %v972_v46 }
 0x3f3   :  { %1762 = vtanh.f32 %v967_v48  ;;  %v1554_v49 = vpop.f32.mrb[34].mxu0 }
 0x3f4   :  { %v982_v51 = vadd.f32 %v1554_v49, %v2329_v44  ;;  %v976_v52 = vpop.f32.mrb[35].mxu0 }
 0x3f5   :  { %v977_v56 = vadd.f32 %v2329_v44, %v976_v52 }
 0x3f6   :  { %1764 = vtanh.f32 %v982_v51 }
 0x3f7   :  { %1766 = vtanh.f32 %v977_v56  ;;  %v1557_v57 = vpop.f32.mrb[36].mxu0 }
 0x3f8   :  { %v992_v58 = vadd.f32 %v1557_v57, %v2329_v44  ;;  %v986_v50 = vpop.f32.mrb[37].mxu0 }
 0x3f9   :  { %v987_v59 = vadd.f32 %v2329_v44, %v986_v50 }
 0x3fa   :  { %1768 = vtanh.f32 %v992_v58 }
 0x3fb   :  { %1770 = vtanh.f32 %v987_v59  ;;  %v1560_v60 = vpop.f32.mrb[38].mxu0 }
 0x3fc   :  { %v1761_v61 = vpop.eup %1760  ;;  %v1002_v54 = vadd.f32 %v1560_v60, %v2329_v44  ;;  %v996_v55 = vpop.f32.mrb[39].mxu0 }
 0x3fd   :  { %v1763_v62 = vpop.eup %1762  ;;  %1062 = vst [vmem:[#allocation13 + $0x8] sm:$0xff] %v1761_v61  ;;  %v997_v53 = vadd.f32 %v2329_v44, %v996_v55 }
 0x3fe   :  { %1061 = vst [vmem:[#allocation13] sm:$0xff] %v1763_v62  ;;  %1772 = vtanh.f32 %v1002_v54 }
 0x3ff   :  { %1774 = vtanh.f32 %v997_v53  ;;  %v1563_v63 = vpop.f32.mrb[32].mxu1 }
 0x400   :  { %v1765_v0 = vpop.eup %1764  ;;  %v1012_v1 = vadd.f32 %v1563_v63, %v2329_v44  ;;  %v1006_v2 = vpop.f32.mrb[33].mxu1 }
 0x401   :  { %v1767_v3 = vpop.eup %1766  ;;  %1064 = vst [vmem:[#allocation13 + $0x18] sm:$0xff] %v1765_v0  ;;  %v1007_v4 = vadd.f32 %v2329_v44, %v1006_v2 }
 0x402   :  { %1063 = vst [vmem:[#allocation13 + $0x10] sm:$0xff] %v1767_v3  ;;  %1776 = vtanh.f32 %v1012_v1 }
 0x403   :  { %1778 = vtanh.f32 %v1007_v4  ;;  %v1566_v5 = vpop.f32.mrb[34].mxu1 }
 0x404   :  { %v1769_v6 = vpop.eup %1768  ;;  %v1022_v7 = vadd.f32 %v1566_v5, %v2329_v44  ;;  %v1016_v8 = vpop.f32.mrb[35].mxu1 }
 0x405   :  { %v1771_v9 = vpop.eup %1770  ;;  %1066 = vst [vmem:[#allocation13 + $0x28] sm:$0xff] %v1769_v6  ;;  %v1017_v10 = vadd.f32 %v2329_v44, %v1016_v8 }
 0x406   :  { %1065 = vst [vmem:[#allocation13 + $0x20] sm:$0xff] %v1771_v9  ;;  %1780 = vtanh.f32 %v1022_v7 }
 0x407   :  { %1782 = vtanh.f32 %v1017_v10  ;;  %v1569_v11 = vpop.f32.mrb[36].mxu1 }
 0x408   :  { %v1773_v12 = vpop.eup %1772  ;;  %v1032_v13 = vadd.f32 %v1569_v11, %v2329_v44  ;;  %v1026_v14 = vpop.f32.mrb[37].mxu1 }
 0x409   :  { %v1775_v15 = vpop.eup %1774  ;;  %1068 = vst [vmem:[#allocation13 + $0x38] sm:$0xff] %v1773_v12  ;;  %v1027_v16 = vadd.f32 %v2329_v44, %v1026_v14 }
 0x40a   :  { %1067 = vst [vmem:[#allocation13 + $0x30] sm:$0xff] %v1775_v15  ;;  %1784 = vtanh.f32 %v1032_v13 }
 0x40b   :  { %1786 = vtanh.f32 %v1027_v16  ;;  %v1572_v17 = vpop.f32.mrb[38].mxu1 }
 0x40c   :  { %v1777_v18 = vpop.eup %1776  ;;  %v1042_v19 = vadd.f32 %v1572_v17, %v2329_v44  ;;  %v1036_v20 = vpop.f32.mrb[39].mxu1 }
 0x40d   :  { %v1779_v21 = vpop.eup %1778  ;;  %1070 = vst [vmem:[#allocation13 + $0x48] sm:$0xff] %v1777_v18  ;;  %v1037_v22 = vadd.f32 %v2329_v44, %v1036_v20 }
 0x40e   :  { %1069 = vst [vmem:[#allocation13 + $0x40] sm:$0xff] %v1779_v21  ;;  %1788 = vtanh.f32 %v1042_v19 }
 0x40f   :  { %1790 = vtanh.f32 %v1037_v22 }
 0x410   :  { %v1781_v23 = vpop.eup %1780 }
 0x411   :  { %v1783_v24 = vpop.eup %1782  ;;  %1072 = vst [vmem:[#allocation13 + $0x58] sm:$0xff] %v1781_v23 }
 0x412   :  { %1071 = vst [vmem:[#allocation13 + $0x50] sm:$0xff] %v1783_v24 }
 0x414   :  { %v1785_v25 = vpop.eup %1784 }
 0x415   :  { %v1787_v26 = vpop.eup %1786  ;;  %1074 = vst [vmem:[#allocation13 + $0x68] sm:$0xff] %v1785_v25 }
 0x416   :  { %1073 = vst [vmem:[#allocation13 + $0x60] sm:$0xff] %v1787_v26 }
 0x418   :  { %v1789_v28 = vpop.eup %1788 }
 0x419   :  { %v1791_v29 = vpop.eup %1790  ;;  %1076 = vst [vmem:[#allocation13 + $0x78] sm:$0xff] %v1789_v28 }
 0x41a   :  { %1075 = vst [vmem:[#allocation13 + $0x70] sm:$0xff] %v1791_v29 }
 0x41b   :  { %1979 = shalt.err (!%p1976_p12)
}
 0x41c   :  { %s1980_s17 = scalar_lea.hbm %s2373_s11, 2048 }
 0x41d   :  { %p1981_p13 = scmp.ne.s32.totalorder %s2373_s11, %s1980_s17  ;;  %p1984_p0 = scmp.lt.u32.totalorder %s1980_s17, %s2373_s11 }
 0x41f   :  { %p1986_p1 = pnand %p1984_p0, %p1981_p13 }
 0x421   :  { %1989 = shalt.err (!%p1986_p1)
}
 0x422   :  { %1088 = dma.vmem_to_hbm [thread:$0]  %s1083_s13, 2048, %s2373_s11, [#allocation4], %s2004_s20, %s2004_s20, %s2005_s21  }
 0x423   :  { %1998 = dma.done.wait [#allocation4], 2048  }
 0x424   :  { %1999 = vsyncadd [#allocation4], 4294965248 }
 0x425   :  { %2000 = dma.done.wait [#allocation15], 4096  }
 0x426   :  { %2001 = vsyncadd [#allocation15], 4294963200 }
 0x427   :  { %1122 = vsyncpa [#allocation3], 1 }
 0x428   :  { %1123 = vsyncpa [#allocation6], 1 }
 0x429   :  { %1124 = vsyncpa [#allocation9], 1 }
 0x42a   :  { %1125 = vsyncpa [#allocation12], 1 }
 0x42b   :  { %1126 = vsyncpa [#allocation4], 1 }
 0x42c   :  { %1127 = vsyncpa [#allocation15], 1 }

</bundles_post_ra>
